<compile_context>
chip_gen: v7x
topology: tpu7x:2x2x1
jax: 0.10.0
libtpu: 0.0.40
codegen_flags: <defaults>
</compile_context>

<pallas_src>
import functools

import jax
import jax.numpy as jnp
from jax.experimental import pallas as pl
from jax.experimental.pallas import tpu as pltpu

IGNORE_INDEX = -100
VOCAB_PAD = 128          # every field vocab (<=33) padded to one 128-lane tile
HIDDEN = 32              # contraction dim, kept unpadded (full-dim block)

DIM_NAMES = ("type", "beat", "position", "pitch", "duration", "instrument")
VOCAB_SIZES = {"type": 5, "beat": 9, "position": 17, "pitch": 33,
               "duration": 13, "instrument": 7}


def _round_up(n, m):
    return ((n + m - 1) // m) * m


# ----------------------------------------------------------------------------
# Pallas kernel: one wide (H, D*Vp) matmul + per-field CE partial sums
# ----------------------------------------------------------------------------
def _ce_kernel(h_ref, w_ref, b_ref, t_ref, loss_ref, cnt_ref, *,
               n_rows, tile_n, tiles_per_split, num_fields):
    """One (split c, row-tile i) grid step.

    h_ref   : (TN, H)       bf16  hidden rows
    w_ref   : (H, D*Vp)     bf16  all field heads, concatenated on lanes
    b_ref   : (1, D*Vp)     f32   biases (-1e9 on padded vocab lanes)
    t_ref   : (TN, D)       int32 per-field targets
    loss_ref: (1, 1, Vp)    f32   lane d = field-d CE partial sum
    cnt_ref : (1, 1, Vp)    f32   lane d = field-d valid-row count
    """
    c = pl.program_id(0)
    i = pl.program_id(1)

    @pl.when(i == 0)
    def _():
        loss_ref[...] = jnp.zeros_like(loss_ref)
        cnt_ref[...] = jnp.zeros_like(cnt_ref)

    # One MXU pass for all heads: bf16 x bf16 -> f32 accumulate.
    logits = jnp.dot(h_ref[...], w_ref[...],
                     preferred_element_type=jnp.float32)          # (TN, D*Vp)
    logits = logits + b_ref[...]                                  # (1, D*Vp)

    # Mask rows past the true row count (ragged tail / clamped duplicate tile).
    start = (c * tiles_per_split + i) * tile_n
    row_ids = start + jax.lax.broadcasted_iota(jnp.int32, (tile_n, 1), 0)
    in_range = row_ids < n_rows                                   # (TN, 1)

    lanes = jax.lax.broadcasted_iota(jnp.int32, (tile_n, VOCAB_PAD), 1)
    field_lane = jax.lax.broadcasted_iota(jnp.int32, (1, 1, VOCAB_PAD), 2)

    loss_acc = jnp.zeros((1, 1, VOCAB_PAD), jnp.float32)
    cnt_acc = jnp.zeros((1, 1, VOCAB_PAD), jnp.float32)

    for d in range(num_fields):                   # static unroll over 6 fields
        # 128-aligned lane-tile slice of the wide logits -> no relayout.
        lg = logits[:, d * VOCAB_PAD:(d + 1) * VOCAB_PAD]         # (TN, Vp)
        m = jnp.max(lg, axis=-1, keepdims=True)                   # (TN, 1)
        lse = m + jnp.log(jnp.sum(jnp.exp(lg - m), axis=-1, keepdims=True))

        tgt = t_ref[:, d:d + 1]                                   # (TN, 1)
        picked = jnp.sum(jnp.where(lanes == tgt, lg, 0.0),
                         axis=-1, keepdims=True)                  # (TN, 1)
        valid = (tgt != IGNORE_INDEX) & in_range                  # (TN, 1)

        loss_rows = jnp.where(valid, lse - picked, 0.0)           # (TN, 1)
        loss_d = jnp.sum(loss_rows, axis=0, keepdims=True)        # (1, 1)
        cnt_d = jnp.sum(valid.astype(jnp.float32),
                        axis=0, keepdims=True)                    # (1, 1)

        loss_acc = loss_acc + jnp.where(field_lane == d, loss_d[None], 0.0)
        cnt_acc = cnt_acc + jnp.where(field_lane == d, cnt_d[None], 0.0)

    loss_ref[...] += loss_acc
    cnt_ref[...] += cnt_acc


def fused_multihead_cross_entropy(hidden, w_cat, b_cat, targets,
                                  *, tile_n=1024, num_splits=2):
    """Per-field mean CE of softmax(hidden @ W_d + b_d) vs targets[:, d],
    ignoring IGNORE_INDEX (PyTorch F.cross_entropy 'mean' semantics), for all
    D fields in one fused pallas_call.

    hidden : (N, H) float (cast to bf16 here; fuses into the producer)
    w_cat  : (H, D*Vp) bf16
    b_cat  : (1, D*Vp) f32
    targets: (N, D) int32
    returns: (D,) f32 per-field mean loss
    """
    n_rows, h_dim = hidden.shape
    num_fields = targets.shape[1]
    assert w_cat.shape == (h_dim, num_fields * VOCAB_PAD)

    # Tile rows; shrink the tile for tiny inputs (keeps sublane alignment).
    tn = min(tile_n, max(16, _round_up(n_rows, 16)))
    tiles_total = pl.cdiv(n_rows, tn)
    n_splits = num_splits if tiles_total >= num_splits else 1
    tps = pl.cdiv(tiles_total, n_splits)          # row tiles per core split
    last_tile = tiles_total - 1

    def row_map(c, i):
        # Clamp so padded grid steps re-read the last valid tile; the kernel
        # masks their rows (global row >= n_rows) so they contribute zero.
        return (jnp.minimum(c * tps + i, last_tile), 0)

    kernel = functools.partial(
        _ce_kernel, n_rows=n_rows, tile_n=tn,
        tiles_per_split=tps, num_fields=num_fields)

    loss_out, cnt_out = pl.pallas_call(
        kernel,
        out_shape=(
            jax.ShapeDtypeStruct((n_splits, 1, VOCAB_PAD), jnp.float32),
            jax.ShapeDtypeStruct((n_splits, 1, VOCAB_PAD), jnp.float32)),
        grid_spec=pltpu.PrefetchScalarGridSpec(
            num_scalar_prefetch=0,
            grid=(n_splits, tps),
            in_specs=[
                pl.BlockSpec((tn, h_dim), row_map),                 # hidden
                pl.BlockSpec((h_dim, num_fields * VOCAB_PAD),
                             lambda c, i: (0, 0)),                  # W_cat
                pl.BlockSpec((1, num_fields * VOCAB_PAD),
                             lambda c, i: (0, 0)),                  # b_cat
                pl.BlockSpec((tn, num_fields), row_map),            # targets
            ],
            out_specs=[
                pl.BlockSpec((1, 1, VOCAB_PAD), lambda c, i: (c, 0, 0)),
                pl.BlockSpec((1, 1, VOCAB_PAD), lambda c, i: (c, 0, 0)),
            ],
        ),
        compiler_params=pltpu.CompilerParams(
            dimension_semantics=("parallel", "arbitrary"),
            vmem_limit_bytes=48 * 1024 * 1024),
    )(hidden.astype(jnp.bfloat16), w_cat, b_cat, targets.astype(jnp.int32))

    loss_sum = jnp.sum(loss_out, axis=(0, 1))[:num_fields]   # (D,)
    count = jnp.sum(cnt_out, axis=(0, 1))[:num_fields]       # (D,)
    return loss_sum / jnp.maximum(count, 1.0)


# ----------------------------------------------------------------------------
# Synthetic net + wrapper forward
# ----------------------------------------------------------------------------
def init_params(key):
    """Deterministic synthetic parameters; heads packed/concatenated once."""
    params = {"emb": [], "W": [], "b": []}
    keys = jax.random.split(key, 3 * len(DIM_NAMES) + 2 * len(DIM_NAMES))
    k = 0
    for _stream in range(3):
        stream_embs = []
        for name in DIM_NAMES:
            v = VOCAB_SIZES[name]
            stream_embs.append(
                0.1 * jax.random.normal(keys[k], (v, HIDDEN), jnp.float32))
            k += 1
        params["emb"].append(stream_embs)
    for name in DIM_NAMES:
        v = VOCAB_SIZES[name]
        params["W"].append(
            0.1 * jax.random.normal(keys[k], (HIDDEN, v), jnp.float32)); k += 1
        params["b"].append(
            0.01 * jax.random.normal(keys[k], (v,), jnp.float32)); k += 1

    # Hoisted head packing (done once, not per forward call): all D heads
    # concatenated along the lane axis for a single wide MXU matmul.
    D = len(DIM_NAMES)
    w_cat = jnp.zeros((HIDDEN, D * VOCAB_PAD), jnp.float32)
    b_cat = jnp.full((1, D * VOCAB_PAD), -1e9, jnp.float32)
    for d, name in enumerate(DIM_NAMES):
        v = VOCAB_SIZES[name]
        w_cat = w_cat.at[:, d * VOCAB_PAD:d * VOCAB_PAD + v].set(params["W"][d])
        b_cat = b_cat.at[0, d * VOCAB_PAD:d * VOCAB_PAD + v].set(params["b"][d])
    params["W_cat"] = w_cat.astype(jnp.bfloat16)   # MXU-native input dtype
    params["b_cat"] = b_cat                        # bias / LSE stay f32
    return params


def synthetic_net_hidden(params, xi, xi1, xi2):
    """Stand-in for self.net body: sum of per-field embeddings over the three
    token streams -> hidden state (B, T-1, H) f32."""
    B, Tm1, D = xi.shape
    hidden = jnp.zeros((B, Tm1, HIDDEN), jnp.float32)
    for s, xs in enumerate((xi, xi1, xi2)):
        for d in range(D):
            hidden = hidden + params["emb"][s][d][xs[..., d]]
    return hidden


def music_autoregressive_wrapper_forward(params, x, x1, x2, return_list=False):
    """Mirrors MusicAutoregressiveWrapper.forward."""
    xi, xi1, xi2 = x[:, :-1], x1[:, :-1], x2[:, :-1]
    xo = x[:, 1:]                                    # (B, T-1, D) targets
    B, Tm1, D = xi.shape

    hidden = synthetic_net_hidden(params, xi, xi1, xi2)
    hidden_flat = hidden.reshape(B * Tm1, HIDDEN)    # bf16 cast fuses in kernel call
    targets = xo.reshape(B * Tm1, D)                 # (N, D), no pad / transpose

    per_field = fused_multihead_cross_entropy(
        hidden_flat, params["W_cat"], params["b_cat"], targets)
    loss = jnp.sum(per_field)
    if return_list:
        return loss, [per_field[d] for d in range(D)]
    return loss


# ----------------------------------------------------------------------------
# Plain-JAX f32 reference (sanity check)
# ----------------------------------------------------------------------------
def _reference_loss(params, x, x1, x2):
    xi, xi1, xi2 = x[:, :-1], x1[:, :-1], x2[:, :-1]
    xo = x[:, 1:]
    B, Tm1, D = xi.shape
    hidden = synthetic_net_hidden(params, xi, xi1, xi2).reshape(B * Tm1, HIDDEN)
    total = 0.0
    for d in range(D):
        logits = hidden @ params["W"][d] + params["b"][d]
        tgt = xo[..., d].reshape(-1)
        lse = jax.scipy.special.logsumexp(logits, axis=-1)
        picked = jnp.take_along_axis(logits, tgt[:, None], axis=-1)[:, 0]
        valid = tgt != IGNORE_INDEX
        per = jnp.where(valid, lse - picked, 0.0)
        total = total + jnp.sum(per) / jnp.maximum(jnp.sum(valid), 1)
    return total


if __name__ == "__main__":
    key = jax.random.PRNGKey(0)
    pkey, tkey = jax.random.split(key)
    params = init_params(pkey)

    B, T, D = 2, 9, len(DIM_NAMES)
    tkeys = jax.random.split(tkey, 3 * D)
    streams = []
    k = 0
    for _ in range(3):
        cols = []
        for name in DIM_NAMES:
            cols.append(jax.random.randint(
                tkeys[k], (B, T), 0, VOCAB_SIZES[name], jnp.int32))
            k += 1
        streams.append(jnp.stack(cols, axis=-1))     # (B, T, D)
    x, x1, x2 = streams

    fwd = jax.jit(functools.partial(
        music_autoregressive_wrapper_forward, return_list=False))
    loss = jax.block_until_ready(fwd(params, x, x1, x2))

    ref = jax.block_until_ready(_reference_loss(params, x, x1, x2))
    assert jnp.isfinite(loss), "non-finite loss"
    # bf16 matmul inputs vs f32 reference -> allow a small tolerance
    assert abs(float(loss) - float(ref)) < 5e-2 * max(1.0, abs(float(ref))), (
        float(loss), float(ref))

    print("KERNEL_OK")
</pallas_src>

<mosaic_0001>
module attributes {stable_mosaic.version = 11 : i64} {
  func.func @_ce_kernel(%arg0: i32, %arg1: i32, %arg2: memref<16x32xbf16, #tpu.memory_space<vmem>>, %arg3: memref<32x768xbf16, #tpu.memory_space<vmem>>, %arg4: memref<1x768xf32, #tpu.memory_space<vmem>>, %arg5: memref<16x6xi32, #tpu.memory_space<vmem>>, %arg6: memref<1x1x128xf32, #tpu.memory_space<vmem>>, %arg7: memref<1x1x128xf32, #tpu.memory_space<vmem>>) attributes {dimension_semantics = [#tpu.dimension_semantics<parallel>, #tpu.dimension_semantics<arbitrary>], iteration_bounds = array<i64: 1, 1>, scalar_prefetch = 0 : i64, scratch_operands = 0 : i64, tpu.core_type = #tpu.core_type<tc>, window_params = [{transform_indices = @transform_0, window_bounds = array<i64: 16, 32>}, {pipeline_mode = #tpu.pipeline_mode<synchronous>, transform_indices = @transform_1, window_bounds = array<i64: 32, 768>}, {pipeline_mode = #tpu.pipeline_mode<synchronous>, transform_indices = @transform_2, window_bounds = array<i64: 1, 768>}, {transform_indices = @transform_3, window_bounds = array<i64: 16, 6>}, {transform_indices = @transform_4, window_bounds = array<i64: 1, 1, 128>}, {transform_indices = @transform_5, window_bounds = array<i64: 1, 1, 128>}]} {
    %c0_i32 = arith.constant 0 : i32
    %0 = arith.cmpi eq, %arg1, %c0_i32 : i32
    %1 = arith.extui %0 : i1 to i32
    %c0_i32_0 = arith.constant 0 : i32
    %2 = arith.cmpi ne, %1, %c0_i32_0 : i32
    scf.if %2 {
      %cst_95 = arith.constant 0.000000e+00 : f32
      %297 = vector.broadcast %cst_95 : f32 to vector<1x1x128xf32>
      %c0_96 = arith.constant 0 : index
      %c0_97 = arith.constant 0 : index
      %c0_98 = arith.constant 0 : index
      %298 = vector.load %arg6[%c0_96, %c0_97, %c0_98] : memref<1x1x128xf32, #tpu.memory_space<vmem>>, vector<1x1x128xf32>
      tpu.vector_store %arg6[%c0_96, %c0_97, %c0_98], %297 {strides = array<i32>} : memref<1x1x128xf32, #tpu.memory_space<vmem>>, vector<1x1x128xf32>,
      %cst_99 = arith.constant 0.000000e+00 : f32
      %299 = vector.broadcast %cst_99 : f32 to vector<1x1x128xf32>
      %c0_100 = arith.constant 0 : index
      %c0_101 = arith.constant 0 : index
      %c0_102 = arith.constant 0 : index
      %300 = vector.load %arg7[%c0_100, %c0_101, %c0_102] : memref<1x1x128xf32, #tpu.memory_space<vmem>>, vector<1x1x128xf32>
      tpu.vector_store %arg7[%c0_100, %c0_101, %c0_102], %299 {strides = array<i32>} : memref<1x1x128xf32, #tpu.memory_space<vmem>>, vector<1x1x128xf32>,
    } else {
    }
    %c0 = arith.constant 0 : index
    %c0_1 = arith.constant 0 : index
    %3 = vector.load %arg2[%c0, %c0_1] : memref<16x32xbf16, #tpu.memory_space<vmem>>, vector<16x32xbf16>
    %c0_2 = arith.constant 0 : index
    %c0_3 = arith.constant 0 : index
    %4 = vector.load %arg3[%c0_2, %c0_3] : memref<32x768xbf16, #tpu.memory_space<vmem>>, vector<32x768xbf16>
    %cst = arith.constant dense<0.000000e+00> : vector<16x768xf32>
    %5 = tpu.matmul %3, %4, %cst {dimension_numbers = #tpu.dot_dimension_numbers<[1], [0], [0], [1], [0, 0, 1, 1], [], []>} : vector<16x32xbf16>, vector<32x768xbf16>, vector<16x768xf32> -> vector<16x768xf32>
    %c0_4 = arith.constant 0 : index
    %c0_5 = arith.constant 0 : index
    %6 = vector.load %arg4[%c0_4, %c0_5] : memref<1x768xf32, #tpu.memory_space<vmem>>, vector<1x768xf32>
    %7 = vector.broadcast %6 : vector<1x768xf32> to vector<16x768xf32>
    %8 = arith.addf %5, %7 : vector<16x768xf32>
    %c1_i32 = arith.constant 1 : i32
    %9 = arith.muli %arg0, %c1_i32 : i32
    %10 = arith.addi %9, %arg1 : i32
    %c16_i32 = arith.constant 16 : i32
    %11 = arith.muli %10, %c16_i32 : i32
    %12 = tpu.iota {dimensions = array<i32: 0>} : vector<16x1xi32>
    %13 = vector.broadcast %11 : i32 to vector<16x1xi32>
    %14 = arith.addi %13, %12 : vector<16x1xi32>
    %c16_i32_6 = arith.constant 16 : i32
    %15 = vector.broadcast %c16_i32_6 : i32 to vector<16x1xi32>
    %16 = arith.cmpi slt, %14, %15 : vector<16x1xi32>
    %17 = tpu.iota {dimensions = array<i32: 1>} : vector<16x128xi32>
    %18 = tpu.iota {dimensions = array<i32: 2>} : vector<1x1x128xi32>
    %cst_7 = arith.constant 0.000000e+00 : f32
    %19 = vector.broadcast %cst_7 : f32 to vector<1x1x128xf32>
    %cst_8 = arith.constant 0.000000e+00 : f32
    %20 = vector.broadcast %cst_8 : f32 to vector<1x1x128xf32>
    %21 = vector.extract_strided_slice %8 {offsets = [0, 0], sizes = [16, 128], strides = [1, 1]} : vector<16x768xf32> to vector<16x128xf32>
    %cst_9 = arith.constant dense<0xFF800000> : vector<16xf32>
    %22 = vector.multi_reduction <maximumf>, %21, %cst_9 [1] : vector<16x128xf32> to vector<16xf32>
    %23 = vector.shape_cast %22 : vector<16xf32> to vector<16x1xf32>
    %24 = vector.broadcast %23 : vector<16x1xf32> to vector<16x128xf32>
    %25 = arith.subf %21, %24 : vector<16x128xf32>
    %26 = math.exp %25 : vector<16x128xf32>
    %cst_10 = arith.constant dense<0.000000e+00> : vector<16xf32>
    %27 = vector.multi_reduction <add>, %26, %cst_10 [1] : vector<16x128xf32> to vector<16xf32>
    %28 = vector.shape_cast %27 : vector<16xf32> to vector<16x1xf32>
    %29 = math.log %28 : vector<16x1xf32>
    %30 = arith.addf %23, %29 : vector<16x1xf32>
    %c0_11 = arith.constant 0 : index
    %c0_12 = arith.constant 0 : index
    %31 = vector.load %arg5[%c0_11, %c0_12] : memref<16x6xi32, #tpu.memory_space<vmem>>, vector<16x1xi32>
    %32 = vector.broadcast %31 : vector<16x1xi32> to vector<16x128xi32>
    %33 = arith.cmpi eq, %17, %32 : vector<16x128xi32>
    %cst_13 = arith.constant 0.000000e+00 : f32
    %34 = vector.broadcast %cst_13 : f32 to vector<16x128xf32>
    %35 = arith.select %33, %21, %34 : vector<16x128xi1>, vector<16x128xf32>
    %cst_14 = arith.constant dense<0.000000e+00> : vector<16xf32>
    %36 = vector.multi_reduction <add>, %35, %cst_14 [1] : vector<16x128xf32> to vector<16xf32>
    %37 = vector.shape_cast %36 : vector<16xf32> to vector<16x1xf32>
    %c-100_i32 = arith.constant -100 : i32
    %38 = vector.broadcast %c-100_i32 : i32 to vector<16x1xi32>
    %39 = arith.cmpi ne, %31, %38 : vector<16x1xi32>
    %40 = arith.andi %39, %16 : vector<16x1xi1>
    %41 = arith.subf %30, %37 : vector<16x1xf32>
    %cst_15 = arith.constant 0.000000e+00 : f32
    %42 = vector.broadcast %cst_15 : f32 to vector<16x1xf32>
    %43 = arith.select %40, %41, %42 : vector<16x1xi1>, vector<16x1xf32>
    %cst_16 = arith.constant dense<0.000000e+00> : vector<1xf32>
    %44 = vector.multi_reduction <add>, %43, %cst_16 [0] : vector<16x1xf32> to vector<1xf32>
    %45 = vector.shape_cast %44 : vector<1xf32> to vector<1x1xf32>
    %46 = arith.extui %40 : vector<16x1xi1> to vector<16x1xi32>
    %47 = arith.sitofp %46 : vector<16x1xi32> to vector<16x1xf32>
    %cst_17 = arith.constant dense<0.000000e+00> : vector<1xf32>
    %48 = vector.multi_reduction <add>, %47, %cst_17 [0] : vector<16x1xf32> to vector<1xf32>
    %49 = vector.shape_cast %48 : vector<1xf32> to vector<1x1xf32>
    %c0_i32_18 = arith.constant 0 : i32
    %50 = vector.broadcast %c0_i32_18 : i32 to vector<1x1x128xi32>
    %51 = arith.cmpi eq, %18, %50 : vector<1x1x128xi32>
    %52 = vector.shape_cast %45 : vector<1x1xf32> to vector<1x1x1xf32>
    %cst_19 = arith.constant 0.000000e+00 : f32
    %53 = vector.shape_cast %52 : vector<1x1x1xf32> to vector<1x1x1xf32>
    %54 = vector.broadcast %53 : vector<1x1x1xf32> to vector<1x1x128xf32>
    %55 = vector.broadcast %cst_19 : f32 to vector<1x1x128xf32>
    %56 = arith.select %51, %54, %55 : vector<1x1x128xi1>, vector<1x1x128xf32>
    %57 = arith.addf %19, %56 : vector<1x1x128xf32>
    %c0_i32_20 = arith.constant 0 : i32
    %58 = vector.broadcast %c0_i32_20 : i32 to vector<1x1x128xi32>
    %59 = arith.cmpi eq, %18, %58 : vector<1x1x128xi32>
    %60 = vector.shape_cast %49 : vector<1x1xf32> to vector<1x1x1xf32>
    %cst_21 = arith.constant 0.000000e+00 : f32
    %61 = vector.shape_cast %60 : vector<1x1x1xf32> to vector<1x1x1xf32>
    %62 = vector.broadcast %61 : vector<1x1x1xf32> to vector<1x1x128xf32>
    %63 = vector.broadcast %cst_21 : f32 to vector<1x1x128xf32>
    %64 = arith.select %59, %62, %63 : vector<1x1x128xi1>, vector<1x1x128xf32>
    %65 = arith.addf %20, %64 : vector<1x1x128xf32>
    %66 = vector.extract_strided_slice %8 {offsets = [0, 128], sizes = [16, 128], strides = [1, 1]} : vector<16x768xf32> to vector<16x128xf32>
    %cst_22 = arith.constant dense<0xFF800000> : vector<16xf32>
    %67 = vector.multi_reduction <maximumf>, %66, %cst_22 [1] : vector<16x128xf32> to vector<16xf32>
    %68 = vector.shape_cast %67 : vector<16xf32> to vector<16x1xf32>
    %69 = vector.broadcast %68 : vector<16x1xf32> to vector<16x128xf32>
    %70 = arith.subf %66, %69 : vector<16x128xf32>
    %71 = math.exp %70 : vector<16x128xf32>
    %cst_23 = arith.constant dense<0.000000e+00> : vector<16xf32>
    %72 = vector.multi_reduction <add>, %71, %cst_23 [1] : vector<16x128xf32> to vector<16xf32>
    %73 = vector.shape_cast %72 : vector<16xf32> to vector<16x1xf32>
    %74 = math.log %73 : vector<16x1xf32>
    %75 = arith.addf %68, %74 : vector<16x1xf32>
    %c0_24 = arith.constant 0 : index
    %c1 = arith.constant 1 : index
    %76 = vector.load %arg5[%c0_24, %c1] : memref<16x6xi32, #tpu.memory_space<vmem>>, vector<16x1xi32>
    %77 = vector.broadcast %76 : vector<16x1xi32> to vector<16x128xi32>
    %78 = arith.cmpi eq, %17, %77 : vector<16x128xi32>
    %cst_25 = arith.constant 0.000000e+00 : f32
    %79 = vector.broadcast %cst_25 : f32 to vector<16x128xf32>
    %80 = arith.select %78, %66, %79 : vector<16x128xi1>, vector<16x128xf32>
    %cst_26 = arith.constant dense<0.000000e+00> : vector<16xf32>
    %81 = vector.multi_reduction <add>, %80, %cst_26 [1] : vector<16x128xf32> to vector<16xf32>
    %82 = vector.shape_cast %81 : vector<16xf32> to vector<16x1xf32>
    %c-100_i32_27 = arith.constant -100 : i32
    %83 = vector.broadcast %c-100_i32_27 : i32 to vector<16x1xi32>
    %84 = arith.cmpi ne, %76, %83 : vector<16x1xi32>
    %85 = arith.andi %84, %16 : vector<16x1xi1>
    %86 = arith.subf %75, %82 : vector<16x1xf32>
    %cst_28 = arith.constant 0.000000e+00 : f32
    %87 = vector.broadcast %cst_28 : f32 to vector<16x1xf32>
    %88 = arith.select %85, %86, %87 : vector<16x1xi1>, vector<16x1xf32>
    %cst_29 = arith.constant dense<0.000000e+00> : vector<1xf32>
    %89 = vector.multi_reduction <add>, %88, %cst_29 [0] : vector<16x1xf32> to vector<1xf32>
    %90 = vector.shape_cast %89 : vector<1xf32> to vector<1x1xf32>
    %91 = arith.extui %85 : vector<16x1xi1> to vector<16x1xi32>
    %92 = arith.sitofp %91 : vector<16x1xi32> to vector<16x1xf32>
    %cst_30 = arith.constant dense<0.000000e+00> : vector<1xf32>
    %93 = vector.multi_reduction <add>, %92, %cst_30 [0] : vector<16x1xf32> to vector<1xf32>
    %94 = vector.shape_cast %93 : vector<1xf32> to vector<1x1xf32>
    %c1_i32_31 = arith.constant 1 : i32
    %95 = vector.broadcast %c1_i32_31 : i32 to vector<1x1x128xi32>
    %96 = arith.cmpi eq, %18, %95 : vector<1x1x128xi32>
    %97 = vector.shape_cast %90 : vector<1x1xf32> to vector<1x1x1xf32>
    %cst_32 = arith.constant 0.000000e+00 : f32
    %98 = vector.shape_cast %97 : vector<1x1x1xf32> to vector<1x1x1xf32>
    %99 = vector.broadcast %98 : vector<1x1x1xf32> to vector<1x1x128xf32>
    %100 = vector.broadcast %cst_32 : f32 to vector<1x1x128xf32>
    %101 = arith.select %96, %99, %100 : vector<1x1x128xi1>, vector<1x1x128xf32>
    %102 = arith.addf %57, %101 : vector<1x1x128xf32>
    %c1_i32_33 = arith.constant 1 : i32
    %103 = vector.broadcast %c1_i32_33 : i32 to vector<1x1x128xi32>
    %104 = arith.cmpi eq, %18, %103 : vector<1x1x128xi32>
    %105 = vector.shape_cast %94 : vector<1x1xf32> to vector<1x1x1xf32>
    %cst_34 = arith.constant 0.000000e+00 : f32
    %106 = vector.shape_cast %105 : vector<1x1x1xf32> to vector<1x1x1xf32>
    %107 = vector.broadcast %106 : vector<1x1x1xf32> to vector<1x1x128xf32>
    %108 = vector.broadcast %cst_34 : f32 to vector<1x1x128xf32>
    %109 = arith.select %104, %107, %108 : vector<1x1x128xi1>, vector<1x1x128xf32>
    %110 = arith.addf %65, %109 : vector<1x1x128xf32>
    %111 = vector.extract_strided_slice %8 {offsets = [0, 256], sizes = [16, 128], strides = [1, 1]} : vector<16x768xf32> to vector<16x128xf32>
    %cst_35 = arith.constant dense<0xFF800000> : vector<16xf32>
    %112 = vector.multi_reduction <maximumf>, %111, %cst_35 [1] : vector<16x128xf32> to vector<16xf32>
    %113 = vector.shape_cast %112 : vector<16xf32> to vector<16x1xf32>
    %114 = vector.broadcast %113 : vector<16x1xf32> to vector<16x128xf32>
    %115 = arith.subf %111, %114 : vector<16x128xf32>
    %116 = math.exp %115 : vector<16x128xf32>
    %cst_36 = arith.constant dense<0.000000e+00> : vector<16xf32>
    %117 = vector.multi_reduction <add>, %116, %cst_36 [1] : vector<16x128xf32> to vector<16xf32>
    %118 = vector.shape_cast %117 : vector<16xf32> to vector<16x1xf32>
    %119 = math.log %118 : vector<16x1xf32>
    %120 = arith.addf %113, %119 : vector<16x1xf32>
    %c0_37 = arith.constant 0 : index
    %c2 = arith.constant 2 : index
    %121 = vector.load %arg5[%c0_37, %c2] : memref<16x6xi32, #tpu.memory_space<vmem>>, vector<16x1xi32>
    %122 = vector.broadcast %121 : vector<16x1xi32> to vector<16x128xi32>
    %123 = arith.cmpi eq, %17, %122 : vector<16x128xi32>
    %cst_38 = arith.constant 0.000000e+00 : f32
    %124 = vector.broadcast %cst_38 : f32 to vector<16x128xf32>
    %125 = arith.select %123, %111, %124 : vector<16x128xi1>, vector<16x128xf32>
    %cst_39 = arith.constant dense<0.000000e+00> : vector<16xf32>
    %126 = vector.multi_reduction <add>, %125, %cst_39 [1] : vector<16x128xf32> to vector<16xf32>
    %127 = vector.shape_cast %126 : vector<16xf32> to vector<16x1xf32>
    %c-100_i32_40 = arith.constant -100 : i32
    %128 = vector.broadcast %c-100_i32_40 : i32 to vector<16x1xi32>
    %129 = arith.cmpi ne, %121, %128 : vector<16x1xi32>
    %130 = arith.andi %129, %16 : vector<16x1xi1>
    %131 = arith.subf %120, %127 : vector<16x1xf32>
    %cst_41 = arith.constant 0.000000e+00 : f32
    %132 = vector.broadcast %cst_41 : f32 to vector<16x1xf32>
    %133 = arith.select %130, %131, %132 : vector<16x1xi1>, vector<16x1xf32>
    %cst_42 = arith.constant dense<0.000000e+00> : vector<1xf32>
    %134 = vector.multi_reduction <add>, %133, %cst_42 [0] : vector<16x1xf32> to vector<1xf32>
    %135 = vector.shape_cast %134 : vector<1xf32> to vector<1x1xf32>
    %136 = arith.extui %130 : vector<16x1xi1> to vector<16x1xi32>
    %137 = arith.sitofp %136 : vector<16x1xi32> to vector<16x1xf32>
    %cst_43 = arith.constant dense<0.000000e+00> : vector<1xf32>
    %138 = vector.multi_reduction <add>, %137, %cst_43 [0] : vector<16x1xf32> to vector<1xf32>
    %139 = vector.shape_cast %138 : vector<1xf32> to vector<1x1xf32>
    %c2_i32 = arith.constant 2 : i32
    %140 = vector.broadcast %c2_i32 : i32 to vector<1x1x128xi32>
    %141 = arith.cmpi eq, %18, %140 : vector<1x1x128xi32>
    %142 = vector.shape_cast %135 : vector<1x1xf32> to vector<1x1x1xf32>
    %cst_44 = arith.constant 0.000000e+00 : f32
    %143 = vector.shape_cast %142 : vector<1x1x1xf32> to vector<1x1x1xf32>
    %144 = vector.broadcast %143 : vector<1x1x1xf32> to vector<1x1x128xf32>
    %145 = vector.broadcast %cst_44 : f32 to vector<1x1x128xf32>
    %146 = arith.select %141, %144, %145 : vector<1x1x128xi1>, vector<1x1x128xf32>
    %147 = arith.addf %102, %146 : vector<1x1x128xf32>
    %c2_i32_45 = arith.constant 2 : i32
    %148 = vector.broadcast %c2_i32_45 : i32 to vector<1x1x128xi32>
    %149 = arith.cmpi eq, %18, %148 : vector<1x1x128xi32>
    %150 = vector.shape_cast %139 : vector<1x1xf32> to vector<1x1x1xf32>
    %cst_46 = arith.constant 0.000000e+00 : f32
    %151 = vector.shape_cast %150 : vector<1x1x1xf32> to vector<1x1x1xf32>
    %152 = vector.broadcast %151 : vector<1x1x1xf32> to vector<1x1x128xf32>
    %153 = vector.broadcast %cst_46 : f32 to vector<1x1x128xf32>
    %154 = arith.select %149, %152, %153 : vector<1x1x128xi1>, vector<1x1x128xf32>
    %155 = arith.addf %110, %154 : vector<1x1x128xf32>
    %156 = vector.extract_strided_slice %8 {offsets = [0, 384], sizes = [16, 128], strides = [1, 1]} : vector<16x768xf32> to vector<16x128xf32>
    %cst_47 = arith.constant dense<0xFF800000> : vector<16xf32>
    %157 = vector.multi_reduction <maximumf>, %156, %cst_47 [1] : vector<16x128xf32> to vector<16xf32>
    %158 = vector.shape_cast %157 : vector<16xf32> to vector<16x1xf32>
    %159 = vector.broadcast %158 : vector<16x1xf32> to vector<16x128xf32>
    %160 = arith.subf %156, %159 : vector<16x128xf32>
    %161 = math.exp %160 : vector<16x128xf32>
    %cst_48 = arith.constant dense<0.000000e+00> : vector<16xf32>
    %162 = vector.multi_reduction <add>, %161, %cst_48 [1] : vector<16x128xf32> to vector<16xf32>
    %163 = vector.shape_cast %162 : vector<16xf32> to vector<16x1xf32>
    %164 = math.log %163 : vector<16x1xf32>
    %165 = arith.addf %158, %164 : vector<16x1xf32>
    %c0_49 = arith.constant 0 : index
    %c3 = arith.constant 3 : index
    %166 = vector.load %arg5[%c0_49, %c3] : memref<16x6xi32, #tpu.memory_space<vmem>>, vector<16x1xi32>
    %167 = vector.broadcast %166 : vector<16x1xi32> to vector<16x128xi32>
    %168 = arith.cmpi eq, %17, %167 : vector<16x128xi32>
    %cst_50 = arith.constant 0.000000e+00 : f32
    %169 = vector.broadcast %cst_50 : f32 to vector<16x128xf32>
    %170 = arith.select %168, %156, %169 : vector<16x128xi1>, vector<16x128xf32>
    %cst_51 = arith.constant dense<0.000000e+00> : vector<16xf32>
    %171 = vector.multi_reduction <add>, %170, %cst_51 [1] : vector<16x128xf32> to vector<16xf32>
    %172 = vector.shape_cast %171 : vector<16xf32> to vector<16x1xf32>
    %c-100_i32_52 = arith.constant -100 : i32
    %173 = vector.broadcast %c-100_i32_52 : i32 to vector<16x1xi32>
    %174 = arith.cmpi ne, %166, %173 : vector<16x1xi32>
    %175 = arith.andi %174, %16 : vector<16x1xi1>
    %176 = arith.subf %165, %172 : vector<16x1xf32>
    %cst_53 = arith.constant 0.000000e+00 : f32
    %177 = vector.broadcast %cst_53 : f32 to vector<16x1xf32>
    %178 = arith.select %175, %176, %177 : vector<16x1xi1>, vector<16x1xf32>
    %cst_54 = arith.constant dense<0.000000e+00> : vector<1xf32>
    %179 = vector.multi_reduction <add>, %178, %cst_54 [0] : vector<16x1xf32> to vector<1xf32>
    %180 = vector.shape_cast %179 : vector<1xf32> to vector<1x1xf32>
    %181 = arith.extui %175 : vector<16x1xi1> to vector<16x1xi32>
    %182 = arith.sitofp %181 : vector<16x1xi32> to vector<16x1xf32>
    %cst_55 = arith.constant dense<0.000000e+00> : vector<1xf32>
    %183 = vector.multi_reduction <add>, %182, %cst_55 [0] : vector<16x1xf32> to vector<1xf32>
    %184 = vector.shape_cast %183 : vector<1xf32> to vector<1x1xf32>
    %c3_i32 = arith.constant 3 : i32
    %185 = vector.broadcast %c3_i32 : i32 to vector<1x1x128xi32>
    %186 = arith.cmpi eq, %18, %185 : vector<1x1x128xi32>
    %187 = vector.shape_cast %180 : vector<1x1xf32> to vector<1x1x1xf32>
    %cst_56 = arith.constant 0.000000e+00 : f32
    %188 = vector.shape_cast %187 : vector<1x1x1xf32> to vector<1x1x1xf32>
    %189 = vector.broadcast %188 : vector<1x1x1xf32> to vector<1x1x128xf32>
    %190 = vector.broadcast %cst_56 : f32 to vector<1x1x128xf32>
    %191 = arith.select %186, %189, %190 : vector<1x1x128xi1>, vector<1x1x128xf32>
    %192 = arith.addf %147, %191 : vector<1x1x128xf32>
    %c3_i32_57 = arith.constant 3 : i32
    %193 = vector.broadcast %c3_i32_57 : i32 to vector<1x1x128xi32>
    %194 = arith.cmpi eq, %18, %193 : vector<1x1x128xi32>
    %195 = vector.shape_cast %184 : vector<1x1xf32> to vector<1x1x1xf32>
    %cst_58 = arith.constant 0.000000e+00 : f32
    %196 = vector.shape_cast %195 : vector<1x1x1xf32> to vector<1x1x1xf32>
    %197 = vector.broadcast %196 : vector<1x1x1xf32> to vector<1x1x128xf32>
    %198 = vector.broadcast %cst_58 : f32 to vector<1x1x128xf32>
    %199 = arith.select %194, %197, %198 : vector<1x1x128xi1>, vector<1x1x128xf32>
    %200 = arith.addf %155, %199 : vector<1x1x128xf32>
    %201 = vector.extract_strided_slice %8 {offsets = [0, 512], sizes = [16, 128], strides = [1, 1]} : vector<16x768xf32> to vector<16x128xf32>
    %cst_59 = arith.constant dense<0xFF800000> : vector<16xf32>
    %202 = vector.multi_reduction <maximumf>, %201, %cst_59 [1] : vector<16x128xf32> to vector<16xf32>
    %203 = vector.shape_cast %202 : vector<16xf32> to vector<16x1xf32>
    %204 = vector.broadcast %203 : vector<16x1xf32> to vector<16x128xf32>
    %205 = arith.subf %201, %204 : vector<16x128xf32>
    %206 = math.exp %205 : vector<16x128xf32>
    %cst_60 = arith.constant dense<0.000000e+00> : vector<16xf32>
    %207 = vector.multi_reduction <add>, %206, %cst_60 [1] : vector<16x128xf32> to vector<16xf32>
    %208 = vector.shape_cast %207 : vector<16xf32> to vector<16x1xf32>
    %209 = math.log %208 : vector<16x1xf32>
    %210 = arith.addf %203, %209 : vector<16x1xf32>
    %c0_61 = arith.constant 0 : index
    %c4 = arith.constant 4 : index
    %211 = vector.load %arg5[%c0_61, %c4] : memref<16x6xi32, #tpu.memory_space<vmem>>, vector<16x1xi32>
    %212 = vector.broadcast %211 : vector<16x1xi32> to vector<16x128xi32>
    %213 = arith.cmpi eq, %17, %212 : vector<16x128xi32>
    %cst_62 = arith.constant 0.000000e+00 : f32
    %214 = vector.broadcast %cst_62 : f32 to vector<16x128xf32>
    %215 = arith.select %213, %201, %214 : vector<16x128xi1>, vector<16x128xf32>
    %cst_63 = arith.constant dense<0.000000e+00> : vector<16xf32>
    %216 = vector.multi_reduction <add>, %215, %cst_63 [1] : vector<16x128xf32> to vector<16xf32>
    %217 = vector.shape_cast %216 : vector<16xf32> to vector<16x1xf32>
    %c-100_i32_64 = arith.constant -100 : i32
    %218 = vector.broadcast %c-100_i32_64 : i32 to vector<16x1xi32>
    %219 = arith.cmpi ne, %211, %218 : vector<16x1xi32>
    %220 = arith.andi %219, %16 : vector<16x1xi1>
    %221 = arith.subf %210, %217 : vector<16x1xf32>
    %cst_65 = arith.constant 0.000000e+00 : f32
    %222 = vector.broadcast %cst_65 : f32 to vector<16x1xf32>
    %223 = arith.select %220, %221, %222 : vector<16x1xi1>, vector<16x1xf32>
    %cst_66 = arith.constant dense<0.000000e+00> : vector<1xf32>
    %224 = vector.multi_reduction <add>, %223, %cst_66 [0] : vector<16x1xf32> to vector<1xf32>
    %225 = vector.shape_cast %224 : vector<1xf32> to vector<1x1xf32>
    %226 = arith.extui %220 : vector<16x1xi1> to vector<16x1xi32>
    %227 = arith.sitofp %226 : vector<16x1xi32> to vector<16x1xf32>
    %cst_67 = arith.constant dense<0.000000e+00> : vector<1xf32>
    %228 = vector.multi_reduction <add>, %227, %cst_67 [0] : vector<16x1xf32> to vector<1xf32>
    %229 = vector.shape_cast %228 : vector<1xf32> to vector<1x1xf32>
    %c4_i32 = arith.constant 4 : i32
    %230 = vector.broadcast %c4_i32 : i32 to vector<1x1x128xi32>
    %231 = arith.cmpi eq, %18, %230 : vector<1x1x128xi32>
    %232 = vector.shape_cast %225 : vector<1x1xf32> to vector<1x1x1xf32>
    %cst_68 = arith.constant 0.000000e+00 : f32
    %233 = vector.shape_cast %232 : vector<1x1x1xf32> to vector<1x1x1xf32>
    %234 = vector.broadcast %233 : vector<1x1x1xf32> to vector<1x1x128xf32>
    %235 = vector.broadcast %cst_68 : f32 to vector<1x1x128xf32>
    %236 = arith.select %231, %234, %235 : vector<1x1x128xi1>, vector<1x1x128xf32>
    %237 = arith.addf %192, %236 : vector<1x1x128xf32>
    %c4_i32_69 = arith.constant 4 : i32
    %238 = vector.broadcast %c4_i32_69 : i32 to vector<1x1x128xi32>
    %239 = arith.cmpi eq, %18, %238 : vector<1x1x128xi32>
    %240 = vector.shape_cast %229 : vector<1x1xf32> to vector<1x1x1xf32>
    %cst_70 = arith.constant 0.000000e+00 : f32
    %241 = vector.shape_cast %240 : vector<1x1x1xf32> to vector<1x1x1xf32>
    %242 = vector.broadcast %241 : vector<1x1x1xf32> to vector<1x1x128xf32>
    %243 = vector.broadcast %cst_70 : f32 to vector<1x1x128xf32>
    %244 = arith.select %239, %242, %243 : vector<1x1x128xi1>, vector<1x1x128xf32>
    %245 = arith.addf %200, %244 : vector<1x1x128xf32>
    %246 = vector.extract_strided_slice %8 {offsets = [0, 640], sizes = [16, 128], strides = [1, 1]} : vector<16x768xf32> to vector<16x128xf32>
    %cst_71 = arith.constant dense<0xFF800000> : vector<16xf32>
    %247 = vector.multi_reduction <maximumf>, %246, %cst_71 [1] : vector<16x128xf32> to vector<16xf32>
    %248 = vector.shape_cast %247 : vector<16xf32> to vector<16x1xf32>
    %249 = vector.broadcast %248 : vector<16x1xf32> to vector<16x128xf32>
    %250 = arith.subf %246, %249 : vector<16x128xf32>
    %251 = math.exp %250 : vector<16x128xf32>
    %cst_72 = arith.constant dense<0.000000e+00> : vector<16xf32>
    %252 = vector.multi_reduction <add>, %251, %cst_72 [1] : vector<16x128xf32> to vector<16xf32>
    %253 = vector.shape_cast %252 : vector<16xf32> to vector<16x1xf32>
    %254 = math.log %253 : vector<16x1xf32>
    %255 = arith.addf %248, %254 : vector<16x1xf32>
    %c0_73 = arith.constant 0 : index
    %c5 = arith.constant 5 : index
    %256 = vector.load %arg5[%c0_73, %c5] : memref<16x6xi32, #tpu.memory_space<vmem>>, vector<16x1xi32>
    %257 = vector.broadcast %256 : vector<16x1xi32> to vector<16x128xi32>
    %258 = arith.cmpi eq, %17, %257 : vector<16x128xi32>
    %cst_74 = arith.constant 0.000000e+00 : f32
    %259 = vector.broadcast %cst_74 : f32 to vector<16x128xf32>
    %260 = arith.select %258, %246, %259 : vector<16x128xi1>, vector<16x128xf32>
    %cst_75 = arith.constant dense<0.000000e+00> : vector<16xf32>
    %261 = vector.multi_reduction <add>, %260, %cst_75 [1] : vector<16x128xf32> to vector<16xf32>
    %262 = vector.shape_cast %261 : vector<16xf32> to vector<16x1xf32>
    %c-100_i32_76 = arith.constant -100 : i32
    %263 = vector.broadcast %c-100_i32_76 : i32 to vector<16x1xi32>
    %264 = arith.cmpi ne, %256, %263 : vector<16x1xi32>
    %265 = arith.andi %264, %16 : vector<16x1xi1>
    %266 = arith.subf %255, %262 : vector<16x1xf32>
    %cst_77 = arith.constant 0.000000e+00 : f32
    %267 = vector.broadcast %cst_77 : f32 to vector<16x1xf32>
    %268 = arith.select %265, %266, %267 : vector<16x1xi1>, vector<16x1xf32>
    %cst_78 = arith.constant dense<0.000000e+00> : vector<1xf32>
    %269 = vector.multi_reduction <add>, %268, %cst_78 [0] : vector<16x1xf32> to vector<1xf32>
    %270 = vector.shape_cast %269 : vector<1xf32> to vector<1x1xf32>
    %271 = arith.extui %265 : vector<16x1xi1> to vector<16x1xi32>
    %272 = arith.sitofp %271 : vector<16x1xi32> to vector<16x1xf32>
    %cst_79 = arith.constant dense<0.000000e+00> : vector<1xf32>
    %273 = vector.multi_reduction <add>, %272, %cst_79 [0] : vector<16x1xf32> to vector<1xf32>
    %274 = vector.shape_cast %273 : vector<1xf32> to vector<1x1xf32>
    %c5_i32 = arith.constant 5 : i32
    %275 = vector.broadcast %c5_i32 : i32 to vector<1x1x128xi32>
    %276 = arith.cmpi eq, %18, %275 : vector<1x1x128xi32>
    %277 = vector.shape_cast %270 : vector<1x1xf32> to vector<1x1x1xf32>
    %cst_80 = arith.constant 0.000000e+00 : f32
    %278 = vector.shape_cast %277 : vector<1x1x1xf32> to vector<1x1x1xf32>
    %279 = vector.broadcast %278 : vector<1x1x1xf32> to vector<1x1x128xf32>
    %280 = vector.broadcast %cst_80 : f32 to vector<1x1x128xf32>
    %281 = arith.select %276, %279, %280 : vector<1x1x128xi1>, vector<1x1x128xf32>
    %282 = arith.addf %237, %281 : vector<1x1x128xf32>
    %c5_i32_81 = arith.constant 5 : i32
    %283 = vector.broadcast %c5_i32_81 : i32 to vector<1x1x128xi32>
    %284 = arith.cmpi eq, %18, %283 : vector<1x1x128xi32>
    %285 = vector.shape_cast %274 : vector<1x1xf32> to vector<1x1x1xf32>
    %cst_82 = arith.constant 0.000000e+00 : f32
    %286 = vector.shape_cast %285 : vector<1x1x1xf32> to vector<1x1x1xf32>
    %287 = vector.broadcast %286 : vector<1x1x1xf32> to vector<1x1x128xf32>
    %288 = vector.broadcast %cst_82 : f32 to vector<1x1x128xf32>
    %289 = arith.select %284, %287, %288 : vector<1x1x128xi1>, vector<1x1x128xf32>
    %290 = arith.addf %245, %289 : vector<1x1x128xf32>
    %c0_83 = arith.constant 0 : index
    %c0_84 = arith.constant 0 : index
    %c0_85 = arith.constant 0 : index
    %291 = vector.load %arg6[%c0_83, %c0_84, %c0_85] : memref<1x1x128xf32, #tpu.memory_space<vmem>>, vector<1x1x128xf32>
    %292 = arith.addf %291, %282 : vector<1x1x128xf32>
    %c0_86 = arith.constant 0 : index
    %c0_87 = arith.constant 0 : index
    %c0_88 = arith.constant 0 : index
    %293 = vector.load %arg6[%c0_86, %c0_87, %c0_88] : memref<1x1x128xf32, #tpu.memory_space<vmem>>, vector<1x1x128xf32>
    tpu.vector_store %arg6[%c0_86, %c0_87, %c0_88], %292 {strides = array<i32>} : memref<1x1x128xf32, #tpu.memory_space<vmem>>, vector<1x1x128xf32>,
    %c0_89 = arith.constant 0 : index
    %c0_90 = arith.constant 0 : index
    %c0_91 = arith.constant 0 : index
    %294 = vector.load %arg7[%c0_89, %c0_90, %c0_91] : memref<1x1x128xf32, #tpu.memory_space<vmem>>, vector<1x1x128xf32>
    %295 = arith.addf %294, %290 : vector<1x1x128xf32>
    %c0_92 = arith.constant 0 : index
    %c0_93 = arith.constant 0 : index
    %c0_94 = arith.constant 0 : index
    %296 = vector.load %arg7[%c0_92, %c0_93, %c0_94] : memref<1x1x128xf32, #tpu.memory_space<vmem>>, vector<1x1x128xf32>
    tpu.vector_store %arg7[%c0_92, %c0_93, %c0_94], %295 {strides = array<i32>} : memref<1x1x128xf32, #tpu.memory_space<vmem>>, vector<1x1x128xf32>,
    return
  }
  func.func @transform_0(%arg0: i32, %arg1: i32) -> (i32, i32) {
    %c1_i32 = arith.constant 1 : i32
    %0 = arith.muli %arg0, %c1_i32 : i32
    %1 = arith.addi %0, %arg1 : i32
    %c0_i32 = arith.constant 0 : i32
    %2 = arith.minsi %1, %c0_i32 : i32
    %c0_i32_0 = arith.constant 0 : i32
    %c0_i32_1 = arith.constant 0 : i32
    return %2, %c0_i32_0 : i32, i32
  }
  func.func @transform_1(%arg0: i32, %arg1: i32) -> (i32, i32) {
    %c0_i32 = arith.constant 0 : i32
    %c0_i32_0 = arith.constant 0 : i32
    %c0_i32_1 = arith.constant 0 : i32
    return %c0_i32, %c0_i32_0 : i32, i32
  }
  func.func @transform_2(%arg0: i32, %arg1: i32) -> (i32, i32) {
    %c0_i32 = arith.constant 0 : i32
    %c0_i32_0 = arith.constant 0 : i32
    %c0_i32_1 = arith.constant 0 : i32
    return %c0_i32, %c0_i32_0 : i32, i32
  }
  func.func @transform_3(%arg0: i32, %arg1: i32) -> (i32, i32) {
    %c1_i32 = arith.constant 1 : i32
    %0 = arith.muli %arg0, %c1_i32 : i32
    %1 = arith.addi %0, %arg1 : i32
    %c0_i32 = arith.constant 0 : i32
    %2 = arith.minsi %1, %c0_i32 : i32
    %c0_i32_0 = arith.constant 0 : i32
    %c0_i32_1 = arith.constant 0 : i32
    return %2, %c0_i32_0 : i32, i32
  }
  func.func @transform_4(%arg0: i32, %arg1: i32) -> (i32, i32, i32) {
    %c0_i32 = arith.constant 0 : i32
    %c0_i32_0 = arith.constant 0 : i32
    %c0_i32_1 = arith.constant 0 : i32
    return %arg0, %c0_i32, %c0_i32_0 : i32, i32, i32
  }
  func.func @transform_5(%arg0: i32, %arg1: i32) -> (i32, i32, i32) {
    %c0_i32 = arith.constant 0 : i32
    %c0_i32_0 = arith.constant 0 : i32
    %c0_i32_1 = arith.constant 0 : i32
    return %arg0, %c0_i32, %c0_i32_0 : i32, i32, i32
  }
}

</mosaic_0001>

<bundles_post_ra>
// kernel: music_autoregressive_wrapper_forward.1
= control target key start
LH: loop header
LB: loop body
LE: loop exit
PB: predicated region body
PF: predicated region fallthrough
CT: control target
= control target key end

     0   :  { %v925_v1 = vmov 0   ;;  %vm390_vm0 = vcmask 7168   ;;  %vm466_vm1 = vcmask 15368   ;;  %vm201_vm4 = vcmask 261120   ;;  %s1344_s1 = inlined_call_operand.vmem [shape: bf16[32,768], index: 1, kind: input, shape index: {}]   ;;  %s1345_s0 = inlined_call_operand.vmem [shape: bf16[16,32], index: 0, kind: input, shape index: {}]   ;;  %s1346_s3 = inlined_call_operand.vmem [shape: s32[16,6], index: 3, kind: input, shape index: {}]   ;;  %s1347_s2 = inlined_call_operand.vmem [shape: f32[1,768], index: 2, kind: input, shape index: {}]   ;;  %s1348_s4 = inlined_call_operand.vmem [shape: f32[1,1,128], index: 4, kind: output, shape index: {0}]   ;;  %s1349_s5 = inlined_call_operand.vmem [shape: f32[1,1,128], index: 5, kind: output, shape index: {1}]  }
   0x1   :  { %v858_v0 = vld [vmem:[%s1344_s1 + $0x4] ss:$24 sps:$4 sm:$0xff]   ;;  %237 = vmatprep.mubr.bf16.mxu0 %v925_v1  ;;  %280 = vmatprep.mubr.bf16.mxu1 %v925_v1  ;;  %v862_v3 = vld [vmem:[%s1344_s1] ss:$24 sps:$4 sm:$0xff]   ;;  %v864_v5 = vld [vmem:[%s1344_s1 + $0x34] ss:$24 sps:$4 sm:$0xff]   ;;  %v106_v39 = vlaneseq }
   0x2   :  { %v860_v2 = vld [vmem:[%s1344_s1 + $0xc] ss:$24 sps:$4 sm:$0xff]   ;;  %840 = vset.pattern.permute.xlu1 %v925_v1  ;;  %839 = vset.pattern.permute.xlu0 %v925_v1  ;;  %v863_v4 = vld [vmem:[%s1344_s1 + $0x8] ss:$24 sps:$4 sm:$0xff]   ;;  %v866_v6 = vld [vmem:[%s1344_s1 + $0x3c] ss:$24 sps:$4 sm:$0xff]  }
   0x3   :  { %205 = vmatprep.subr.bf16.mxu0 %v858_v0  ;;  %248 = vmatprep.subr.bf16.mxu1 %v860_v2  ;;  %v868_v7 = vld [vmem:[%s1344_s1 + $0x30] ss:$24 sps:$4 sm:$0xff]   ;;  %v870_v9 = vld [vmem:[%s1345_s0] sm:$0xff]   ;;  %v926_v12 = vmov 0.0   ;;  %v927_v22 = vmov 1   ;;  %v928_v34 = vmov 2  }
   0x4   :  { %206 = vmatpush1.bf16.msra.mxu0 %v862_v3  ;;  %249 = vmatpush1.bf16.msra.mxu1 %v863_v4  ;;  %v869_v8 = vld [vmem:[%s1344_s1 + $0x38] ss:$24 sps:$4 sm:$0xff]   ;;  %v996_v10 = vld [vmem:[%s1346_s3 + $0x8] sm:$0xff]  ;;  %v1001_v11 = vld [vmem:[%s1346_s3] sm:$0xff]  ;;  %v1047_v40 = vshrl.u32 %v106_v39, 7  ;;  %v1062_v48 = vand.u32 127, %v106_v39 }
   0x5   :  { %207 = vmatprep.subr.bf16.mxu0 %v864_v5  ;;  %250 = vmatprep.subr.bf16.mxu1 %v866_v6  ;;  %vm383_vm2 = vcmp.ne.s32.totalorder %v996_v10, 4294967196  ;;  %vm382_vm3 = vcmp.ne.s32.totalorder %v1001_v11, 4294967196  ;;  %v871_v35 = vld [vmem:[%s1344_s1 + $0x10] ss:$24 sps:$4 sm:$0xff]   ;;  %v873_v36 = vld [vmem:[%s1344_s1 + $0x14] ss:$24 sps:$4 sm:$0xff]  }
   0x6   :  { %372 = vperm.xlu1 %840, %v996_v10   ;;  %369 = vperm.xlu0 %839, %v1001_v11   ;;  %v1010_v13 = vsel %vm382_vm3, 1.0, %v926_v12  ;;  %v1015_v14 = vsel %vm383_vm2, 1.0, %v926_v12  ;;  %v876_v37 = vld [vmem:[%s1344_s1 + $0x44] ss:$24 sps:$4 sm:$0xff]   ;;  %v874_v38 = vld [vmem:[%s1344_s1 + $0x40] ss:$24 sps:$4 sm:$0xff]  }
   0x7   :  { %v404_v15 = vsel %vm390_vm0, %v1010_v13, 0.0  ;;  %v405_v16 = vsel %vm390_vm0, %v1015_v14, 0.0  ;;  %v476_v17 = vsel %vm466_vm1, %v1010_v13, 0.0  ;;  %v477_v18 = vsel %vm466_vm1, %v1015_v14, 0.0  ;;  %v1054_v43 = vld [vmem:[%s1347_s2] sm:$0x3f] }
   0x8   :  { %208 = vmatpush1.bf16.msra.mxu0 %v868_v7  ;;  %251 = vmatpush1.bf16.msra.mxu1 %v869_v8  ;;  %v406_v19 = vadd.f32 %v405_v16, %v404_v15  ;;  %v478_v20 = vadd.f32 %v477_v18, %v476_v17  ;;  %v108_v41 = vsub.s32 0, %v1047_v40  ;;  %v116_v42 = vsub.s32 2, %v1047_v40  ;;  %88 = vst [vmem:[%s1348_s4] sm:$0x1] %v926_v12 }
   0x9   :  { %291 = vmatprep.subr.bf16.mxu0 %v873_v36  ;;  %v120_v44 = vsub.s32 3, %v1047_v40  ;;  %v112_v54 = vsub.s32 1, %v1047_v40  ;;  %v929_v17 = vmov 3   ;;  %vm538_vm9 = vcmask 23568   ;;  %89 = vst [vmem:[%s1349_s5] sm:$0x1] %v926_v12 }
   0xa   :  { %v407_v21 = vrot.slane %v406_v19, 4  ;;  %841 = vset.pattern.permute.xlu0 %v927_v22  ;;  %v479_v23 = vrot.slane %v478_v20, 4  ;;  %v109_v45 = vrot.slane %v1054_v43, %v108_v41  ;;  %v117_v46 = vrot.slane %v1054_v43, %v116_v42 }
   0xb   :  { %827 = vmatmul.mubr.msk.bf16.vlgmr.msra.gmra.mrb[0].mxu0 %vm201_vm4, %v870_v9  ;;  %828 = vmatmul.mubr.msk.bf16.vlgmr.msra.gmra.mrb[0].mxu1 %vm201_vm4, %v870_v9  ;;  %v1060_v47 = vrot.slane %v1054_v43, %v120_v44  ;;  %v113_v63 = vrot.slane %v1054_v43, %v112_v54  ;;  %vm413_vm11 = vcmp.eq.s32.totalorder %v1062_v48, 0  ;;  %vm485_vm12 = vcmp.eq.s32.totalorder %v1062_v48, 1 }
   0xc   :  { %323 = vmatprep.mubr.bf16.mxu0 %v925_v1  ;;  %449 = vperm.xlu0 %841, %v1001_v11   ;;  %v408_v24 = vadd.f32 %v407_v21, %v406_v19  ;;  %v480_v25 = vadd.f32 %v479_v23, %v478_v20  ;;  %vm557_vm14 = vcmp.eq.s32.totalorder %v1062_v48, 2 }
   0xd   :  { %292 = vmatpush1.bf16.msra.mxu0 %v871_v35 }
   0xe   :  { %v409_v26 = vrot.slane %v408_v24, 2  ;;  %v481_v27 = vrot.slane %v480_v25, 2  ;;  %293 = vmatprep.subr.bf16.mxu0 %v876_v37 }
  0x10   :  { %v410_v28 = vadd.f32 %v409_v26, %v408_v24  ;;  %v482_v30 = vadd.f32 %v481_v27, %v480_v25  ;;  %843 = vset.pattern.permute.xlu0 %v928_v34  ;;  %v548_v24 = vsel %vm538_vm9, %v1010_v13, 0.0  ;;  %v549_v25 = vsel %vm538_vm9, %v1015_v14, 0.0 }
  0x11   :  { %294 = vmatpush1.bf16.msra.mxu0 %v874_v38  ;;  %v550_v27 = vadd.f32 %v549_v25, %v548_v24 }
  0x12   :  { %v411_v29 = vrot.slane %v410_v28, 1  ;;  %v483_v32 = vrot.slane %v482_v30, 1 }
  0x14   :  { %v412_v31 = vadd.f32 %v411_v29, %v410_v28  ;;  %v484_v33 = vadd.f32 %v483_v32, %v482_v30  ;;  %829 = vmatmul.mubr.msk.bf16.vlgmr.msra.gmra.mrb[4].mxu0 %vm201_vm4, %v870_v9  ;;  %v551_v29 = vrot.slane %v550_v27, 4 }
  0x16   :  { %423 = vperm.xlu1 %840, %v412_v31   ;;  %v552_v31 = vadd.f32 %v551_v29, %v550_v27 }
  0x18   :  { %v553_v32 = vrot.slane %v552_v31, 2 }
  0x1a   :  { %842 = vset.pattern.permute.xlu1 %v927_v22 }
  0x1b   :  { %452 = vperm.xlu1 %842, %v996_v10  }
  0x1f   :  { %495 = vperm.xlu1 %842, %v484_v33   ;;  %v554_v33 = vadd.f32 %v553_v32, %v552_v31 }
  0x21   :  { %v555_v35 = vrot.slane %v554_v33, 1 }
  0x23   :  { %844 = vset.pattern.permute.xlu1 %v928_v34  ;;  %v556_v36 = vadd.f32 %v555_v35, %v554_v33 }
  0x85   :  { %v370_v49 = vpop.permute.xlu0 %369  ;;  %v373_v62 = vpop.permute.xlu1 %372 }
  0x86   :  { %vm374_vm5 = vcmp.eq.s32.totalorder %v1062_v48, %v370_v49  ;;  %vm375_vm6 = vcmp.eq.s32.totalorder %v1062_v48, %v373_v62 }
  0x8b   :  { %v450_v3 = vpop.permute.xlu0 %449 }
  0x8c   :  { %vm454_vm7 = vcmp.eq.s32.totalorder %v1062_v48, %v450_v3 }
  0x95   :  { %v1083_v6 = vpop.permute.xlu1 %423 }
  0x96   :  { %v426_v3 = vsel %vm413_vm11, %v1083_v6, 0.0 }
  0x9a   :  { %v453_v9 = vpop.permute.xlu1 %452 }
  0x9b   :  { %vm455_vm8 = vcmp.eq.s32.totalorder %v1062_v48, %v453_v9 }
  0xde   :  { %v239_v50 = vpop.f32.mrb[0].mxu0  ;;  %v282_v51 = vpop.f32.mrb[0].mxu1 }
  0xdf   :  { %v1064_v52 = vadd.f32 %v239_v50, %v109_v45  ;;  %v1066_v53 = vadd.f32 %v282_v51, %v117_v46  ;;  %v241_v55 = vpop.f32.mrb[1].mxu0  ;;  %v284_v56 = vpop.f32.mrb[1].mxu1 }
  0xe0   :  { %v243_v57 = vpop.f32.mrb[2].mxu0  ;;  %v1070_v58 = vadd.f32 %v284_v56, %v1060_v47  ;;  %v286_v59 = vpop.f32.mrb[2].mxu1  ;;  %v1079_v4 = vadd.f32 %v241_v55, %v113_v63  ;;  %v930_v56 = vmov 4  }
  0xe1   :  { %500 = vmax.xlane.f32.xlu1 %v1066_v53  ;;  %v245_v60 = vpop.f32.mrb[3].mxu0  ;;  %346 = vmax.xlane.f32.xlu0 %v1064_v52  ;;  %v1075_v61 = vpop.f32.mrb[3].mxu1  ;;  %v244_v0 = vadd.f32 %v243_v57, %v109_v45  ;;  %v376_v2 = vsel %vm374_vm5, %v1064_v52, 0.0  ;;  %v1081_v5 = vadd.f32 %v286_v59, %v117_v46  ;;  %vm610_vm5 = vcmask 31768  }
  0xe2   :  { %v456_v8 = vsel %vm454_vm7, %v1079_v4, 0.0  ;;  %v1090_v15 = vadd.f32 %v245_v60, %v113_v63  ;;  %v1126_v51 = vadd.f32 %v1075_v61, %v1060_v47  ;;  %v931_v47 = vmov 5   ;;  %v496_v57 = vpop.permute.xlu1 %495 }
  0xe3   :  { %v377_v7 = vsel %vm375_vm6, %v244_v0, 0.0  ;;  %vm682_vm6 = vcmask 39968  }
  0xe4   :  { %v457_v16 = vsel %vm455_vm8, %v1090_v15, 0.0 }
  0xe5   :  { %348 = vmax.xlane.f32.xlu0 %v244_v0  ;;  %378 = vadd.xlane.f32.xlu1 %v376_v2 }
  0xe7   :  { %v325_v37 = vpop.f32.mrb[4].mxu0 }
  0xe8   :  { %v327_v38 = vpop.f32.mrb[5].mxu0 }
  0xe9   :  { %502 = vmax.xlane.f32.xlu0 %v1081_v5  ;;  %428 = vmax.xlane.f32.xlu1 %v1079_v4  ;;  %v329_v39 = vpop.f32.mrb[6].mxu0 }
  0xea   :  { %v1117_v41 = vpop.f32.mrb[7].mxu0 }
  0xed   :  { %380 = vadd.xlane.f32.xlu0 %v377_v7  ;;  %458 = vadd.xlane.f32.xlu1 %v456_v8  ;;  %v498_v7 = vsel %vm485_vm12, %v496_v57, 0.0 }
  0xf1   :  { %430 = vmax.xlane.f32.xlu0 %v1090_v15 }
  0xf5   :  { %460 = vadd.xlane.f32.xlu0 %v457_v16  ;;  %v499_v16 = vadd.f32 %v498_v7, %v426_v3 }
 0x10b   :  { %521 = vperm.xlu0 %843, %v1001_v11  }
 0x10f   :  { %845 = vset.pattern.permute.xlu0 %v929_v17 }
 0x16e   :  { %v1097_v18 = vpop.xlane.xlu0 %346  ;;  %v1137_v59 = vpop.xlane.xlu1 %500 }
 0x16f   :  { %v350_v42 = vsub.f32 %v1064_v52, %v1097_v18 }
 0x171   :  { %v352_v44 = vmul.f32 1.442695, %v350_v42 }
 0x172   :  { %v1099_v19 = vpop.xlane.xlu0 %348  ;;  %v379_v60 = vpop.xlane.xlu1 %378 }
 0x173   :  { %v351_v45 = vsub.f32 %v244_v0, %v1099_v19  ;;  %877 = vpow2.f32 %v352_v44  ;;  %v124_v0 = vsub.s32 4, %v1047_v40 }
 0x175   :  { %v354_v46 = vmul.f32 1.442695, %v351_v45  ;;  %v125_v9 = vrot.slane %v1054_v43, %v124_v0 }
 0x176   :  { %v1101_v20 = vpop.xlane.xlu0 %502  ;;  %v1139_v61 = vpop.xlane.xlu1 %428 }
 0x177   :  { %v505_v49 = vsub.f32 %v1081_v5, %v1101_v20  ;;  %879 = vpow2.f32 %v354_v46  ;;  %v1162_v6 = vadd.f32 %v325_v37, %v125_v9  ;;  %v432_v32 = vsub.f32 %v1079_v4, %v1139_v61 }
 0x179   :  { %v508_v50 = vmul.f32 1.442695, %v505_v49  ;;  %v434_v35 = vmul.f32 1.442695, %v432_v32 }
 0x17a   :  { %v1103_v21 = vpop.xlane.xlu0 %380  ;;  %v1141_v62 = vpop.xlane.xlu1 %458 }
 0x17b   :  { %881 = vpow2.f32 %v508_v50 }
 0x17d   :  { %v878_v54 = vpop.eup %877 }
 0x17e   :  { %v1105_v23 = vpop.xlane.xlu0 %430 }
 0x17f   :  { %v433_v7 = vsub.f32 %v1090_v15, %v1105_v23 }
 0x181   :  { %v880_v52 = vpop.eup %879 }
 0x182   :  { %v1111_v26 = vpop.xlane.xlu0 %460 }
 0x185   :  { %v882_v55 = vpop.eup %881 }
 0x18a   :  { %v522_v28 = vpop.permute.xlu0 %521 }
 0x18b   :  { %vm526_vm10 = vcmp.eq.s32.totalorder %v1062_v48, %v522_v28  ;;  %v128_v28 = vsub.s32 5, %v1047_v40 }
 0x18c   :  { %v528_v30 = vsel %vm526_vm10, %v1066_v53, 0.0  ;;  %vm773_vm10 = vcmp.eq.s32.totalorder %v1062_v48, 5 }
 0x18d   :  { %530 = vadd.xlane.f32.xlu1 %v528_v30  ;;  %v129_v29 = vrot.slane %v1054_v43, %v128_v28  ;;  %v1169_v30 = vadd.f32 %v329_v39, %v125_v9 }
 0x18f   :  { %v1173_v33 = vadd.f32 %v327_v38, %v129_v29  ;;  %v1178_v40 = vadd.f32 %v1117_v41, %v129_v29 }
 0x19e   :  { %524 = vperm.xlu1 %844, %v996_v10  }
 0x1a2   :  { %567 = vperm.xlu1 %844, %v556_v36  }
 0x1a6   :  { %846 = vset.pattern.permute.xlu1 %v929_v17 }
 0x1c6   :  { %574 = vmax.xlane.f32.xlu1 %v1126_v51 }
 0x1ca   :  { %356 = vadd.xlane.f32.xlu1 %v878_v54 }
 0x1ce   :  { %358 = vadd.xlane.f32.xlu1 %v880_v52 }
 0x1d2   :  { %512 = vadd.xlane.f32.xlu1 %v882_v55 }
 0x1e3   :  { %596 = vperm.xlu1 %846, %v996_v10  }
 0x1e7   :  { %847 = vset.pattern.permute.xlu1 %v930_v56 }
 0x1e8   :  { %665 = vperm.xlu1 %847, %v1001_v11  }
 0x1ec   :  { %668 = vperm.xlu1 %847, %v996_v10  }
 0x1f0   :  { %848 = vset.pattern.permute.xlu1 %v931_v47 }
 0x1f1   :  { %737 = vperm.xlu1 %848, %v1001_v11  }
 0x1f5   :  { %740 = vperm.xlu1 %848, %v996_v10  }
 0x1f9   :  { %849 = vset.pattern.permute.xlu1 %v929_v17 }
 0x21a   :  { %v1143_v63 = vpop.xlane.xlu1 %530 }
 0x21e   :  { %v525_v2 = vpop.permute.xlu1 %524 }
 0x21f   :  { %vm527_vm13 = vcmp.eq.s32.totalorder %v1062_v48, %v525_v2 }
 0x220   :  { %v529_v8 = vsel %vm527_vm13, %v1081_v5, 0.0  ;;  %v504_v5 = vsub.f32 %v1066_v53, %v1137_v59 }
 0x221   :  { %532 = vadd.xlane.f32.xlu0 %v529_v8 }
 0x222   :  { %v568_v24 = vpop.permute.xlu1 %567  ;;  %v506_v31 = vmul.f32 1.442695, %v504_v5 }
 0x223   :  { %v570_v25 = vsel %vm557_vm14, %v568_v24, 0.0 }
 0x224   :  { %v1159_v27 = vadd.f32 %v570_v25, %v499_v16  ;;  %883 = vpow2.f32 %v506_v31  ;;  %v436_v16 = vmul.f32 1.442695, %v433_v7 }
 0x225   :  { %572 = vmax.xlane.f32.xlu0 %v1070_v58  ;;  %885 = vpow2.f32 %v434_v35 }
 0x229   :  { %644 = vmax.xlane.f32.xlu0 %v1162_v6 }
 0x22d   :  { %646 = vmax.xlane.f32.xlu0 %v1169_v30 }
 0x22e   :  { %v884_v43 = vpop.eup %883 }
 0x22f   :  { %v886_v53 = vpop.eup %885 }
 0x231   :  { %716 = vmax.xlane.f32.xlu0 %v1173_v33 }
 0x235   :  { %718 = vmax.xlane.f32.xlu0 %v1178_v40 }
 0x239   :  { %510 = vadd.xlane.f32.xlu0 %v884_v43 }
 0x23d   :  { %438 = vadd.xlane.f32.xlu0 %v886_v53 }
 0x253   :  { %v1181_v36 = vpop.xlane.xlu1 %574 }
 0x254   :  { %v577_v24 = vsub.f32 %v1126_v51, %v1181_v36 }
 0x257   :  { %v357_v4 = vpop.xlane.xlu1 %356 }
 0x258   :  { %887 = vlog2.f32 %v357_v4 }
 0x25b   :  { %v359_v37 = vpop.xlane.xlu1 %358 }
 0x25c   :  { %889 = vlog2.f32 %v359_v37 }
 0x25f   :  { %v513_v0 = vpop.xlane.xlu1 %512 }
 0x260   :  { %891 = vlog2.f32 %v513_v0 }
 0x262   :  { %v888_v38 = vpop.eup %887 }
 0x263   :  { %v361_v39 = vmul.f32 0.6931472, %v888_v38  ;;  %v597_v15 = vpop.permute.xlu1 %596 }
 0x264   :  { %vm599_vm15 = vcmp.eq.s32.totalorder %v1062_v48, %v597_v15 }
 0x265   :  { %v364_v44 = vadd.f32 %v361_v39, %v1097_v18  ;;  %v601_v32 = vsel %vm599_vm15, %v1126_v51, 0.0 }
 0x266   :  { %v890_v42 = vpop.eup %889 }
 0x267   :  { %v363_v41 = vmul.f32 0.6931472, %v890_v42  ;;  %v386_v45 = vsub.f32 %v364_v44, %v379_v60  ;;  %v1211_v29 = vpop.permute.xlu1 %665 }
 0x269   :  { %v365_v46 = vadd.f32 %v363_v41, %v1099_v19  ;;  %v388_v49 = vsel %vm382_vm3, %v386_v45, 0.0 }
 0x26a   :  { %v391_v52 = vsel %vm390_vm0, %v388_v49, 0.0  ;;  %v892_v18 = vpop.eup %891 }
 0x26b   :  { %v387_v50 = vsub.f32 %v365_v46, %v1103_v21  ;;  %v517_v60 = vmul.f32 0.6931472, %v892_v18  ;;  %v669_v31 = vpop.permute.xlu1 %668 }
 0x26d   :  { %v389_v54 = vsel %vm383_vm2, %v387_v50, 0.0  ;;  %v1195_v19 = vadd.f32 %v517_v60, %v1101_v20  ;;  %v580_v20 = vmul.f32 1.442695, %v577_v24 }
 0x26e   :  { %v392_v55 = vsel %vm390_vm0, %v389_v54, 0.0  ;;  %vm671_vm0 = vcmp.eq.s32.totalorder %v1062_v48, %v669_v31 }
 0x26f   :  { %v1192_v57 = vadd.f32 %v392_v55, %v391_v52  ;;  %v673_v35 = vsel %vm671_vm0, %v1169_v30, 0.0 }
 0x2ae   :  { %v1197_v2 = vpop.xlane.xlu0 %532 }
 0x2af   :  { %v535_v21 = vsub.f32 %v1195_v19, %v1197_v2 }
 0x2b2   :  { %v1201_v3 = vpop.xlane.xlu0 %572 }
 0x2b3   :  { %v576_v8 = vsub.f32 %v1070_v58, %v1201_v3 }
 0x2b5   :  { %v578_v9 = vmul.f32 1.442695, %v576_v8 }
 0x2b6   :  { %v1217_v43 = vpop.xlane.xlu0 %644 }
 0x2b7   :  { %893 = vpow2.f32 %v578_v9  ;;  %v648_v51 = vsub.f32 %v1162_v6, %v1217_v43 }
 0x2b8   :  { %895 = vpow2.f32 %v436_v16 }
 0x2b9   :  { %897 = vpow2.f32 %v580_v20  ;;  %v650_v41 = vmul.f32 1.442695, %v648_v51 }
 0x2ba   :  { %v1219_v53 = vpop.xlane.xlu0 %646 }
 0x2bb   :  { %v649_v49 = vsub.f32 %v1169_v30, %v1219_v53 }
 0x2bd   :  { %v652_v0 = vmul.f32 1.442695, %v649_v49 }
 0x2be   :  { %v1221_v4 = vpop.xlane.xlu0 %716 }
 0x2bf   :  { %v720_v45 = vsub.f32 %v1173_v33, %v1221_v4 }
 0x2c1   :  { %v894_v25 = vpop.eup %893  ;;  %v722_v50 = vmul.f32 1.442695, %v720_v45 }
 0x2c2   :  { %582 = vadd.xlane.f32.xlu0 %v894_v25  ;;  %v896_v28 = vpop.eup %895 }
 0x2c3   :  { %v898_v5 = vpop.eup %897 }
 0x2c6   :  { %440 = vadd.xlane.f32.xlu0 %v896_v28 }
 0x2ca   :  { %584 = vadd.xlane.f32.xlu0 %v898_v5 }
 0x2e0   :  { %593 = vperm.xlu0 %845, %v1001_v11  }
 0x2e4   :  { %853 = vset.pattern.permute.xlu0 %v927_v22  ;;  %v1223_v22 = vpop.xlane.xlu0 %718 }
 0x2e5   :  { %v721_v18 = vsub.f32 %v1178_v40, %v1223_v22 }
 0x2e8   :  { %v511_v37 = vpop.xlane.xlu0 %510 }
 0x2ec   :  { %v439_v38 = vpop.xlane.xlu0 %438 }
 0x2ed   :  { %899 = vlog2.f32 %v439_v38  ;;  %v621_v38 = vsel %vm610_vm5, %v1015_v14, 0.0 }
 0x2f7   :  { %v900_v44 = vpop.eup %899 }
 0x2f8   :  { %v443_v46 = vmul.f32 0.6931472, %v900_v44 }
 0x2fa   :  { %v446_v54 = vadd.f32 %v443_v46, %v1139_v61  ;;  %v724_v61 = vmul.f32 1.442695, %v721_v18 }
 0x2fc   :  { %v462_v60 = vsub.f32 %v446_v54, %v1141_v62  ;;  %v693_v54 = vsel %vm682_vm6, %v1015_v14, 0.0 }
 0x2fe   :  { %v464_v16 = vsel %vm382_vm3, %v462_v60, 0.0 }
 0x2ff   :  { %604 = vadd.xlane.f32.xlu0 %v601_v32  ;;  %v467_v25 = vsel %vm466_vm1, %v464_v16, 0.0 }
 0x303   :  { %676 = vadd.xlane.f32.xlu0 %v673_v35 }
 0x34f   :  { %v1225_v39 = vpop.xlane.xlu0 %582 }
 0x353   :  { %v441_v42 = vpop.xlane.xlu0 %440 }
 0x354   :  { %901 = vlog2.f32 %v441_v42  ;;  %v738_v42 = vpop.permute.xlu1 %737 }
 0x355   :  { %903 = vpow2.f32 %v650_v41  ;;  %vm742_vm7 = vcmp.eq.s32.totalorder %v1062_v48, %v738_v42 }
 0x356   :  { %905 = vpow2.f32 %v722_v50  ;;  %v692_v50 = vsel %vm682_vm6, %v1010_v13, 0.0  ;;  %v744_v60 = vsel %vm742_vm7, %v1173_v33, 0.0 }
 0x357   :  { %v1234_v52 = vpop.xlane.xlu0 %584  ;;  %907 = vpow2.f32 %v652_v0  ;;  %v694_v18 = vadd.f32 %v693_v54, %v692_v50 }
 0x358   :  { %909 = vlog2.f32 %v511_v37  ;;  %v620_v37 = vsel %vm610_vm5, %v1010_v13, 0.0 }
 0x359   :  { %911 = vpow2.f32 %v724_v61  ;;  %v622_v46 = vadd.f32 %v621_v38, %v620_v37 }
 0x35a   :  { %913 = vlog2.f32 %v1234_v52 }
 0x35b   :  { %v623_v0 = vrot.slane %v622_v46, 4  ;;  %915 = vlog2.f32 %v1225_v39 }
 0x35e   :  { %v902_v55 = vpop.eup %901 }
 0x35f   :  { %v445_v7 = vmul.f32 0.6931472, %v902_v55  ;;  %v594_v8 = vpop.permute.xlu0 %593  ;;  %v904_v20 = vpop.eup %903 }
 0x360   :  { %vm598_vm4 = vcmp.eq.s32.totalorder %v1062_v48, %v594_v8  ;;  %v695_v8 = vrot.slane %v694_v18, 4 }
 0x361   :  { %v447_v30 = vadd.f32 %v445_v7, %v1105_v23  ;;  %v600_v9 = vsel %vm598_vm4, %v1070_v58, 0.0  ;;  %v906_v23 = vpop.eup %905  ;;  %v624_v7 = vadd.f32 %v623_v0, %v622_v46 }
 0x362   :  { %602 = vadd.xlane.f32.xlu1 %v600_v9  ;;  %v908_v31 = vpop.eup %907  ;;  %v696_v33 = vadd.f32 %v695_v8, %v694_v18 }
 0x363   :  { %v463_v24 = vsub.f32 %v447_v30, %v1111_v26  ;;  %v910_v26 = vpop.eup %909  ;;  %v625_v9 = vrot.slane %v624_v7, 2 }
 0x364   :  { %v912_v51 = vpop.eup %911  ;;  %v515_v41 = vmul.f32 0.6931472, %v910_v26 }
 0x365   :  { %v465_v62 = vsel %vm383_vm2, %v463_v24, 0.0  ;;  %v626_v16 = vadd.f32 %v625_v9, %v624_v7  ;;  %v394_v24 = vrot.slane %v1192_v57, 4  ;;  %v914_v38 = vpop.eup %913 }
 0x366   :  { %v468_v28 = vsel %vm466_vm1, %v465_v62, 0.0  ;;  %654 = vadd.xlane.f32.xlu1 %v904_v20  ;;  %vm670_vm1 = vcmp.eq.s32.totalorder %v1062_v48, %v1211_v29  ;;  %v518_v55 = vadd.f32 %v515_v41, %v1137_v59  ;;  %v741_v29 = vpop.permute.xlu1 %740  ;;  %v916_v42 = vpop.eup %915 }
 0x367   :  { %v469_v58 = vadd.f32 %v468_v28, %v467_v25  ;;  %v672_v49 = vsel %vm670_vm1, %v1162_v6, 0.0  ;;  %vm743_vm8 = vcmp.eq.s32.totalorder %v1062_v48, %v741_v29  ;;  %v627_v62 = vrot.slane %v626_v16, 1 }
 0x368   :  { %v534_v6 = vsub.f32 %v518_v55, %v1143_v63  ;;  %v745_v30 = vsel %vm743_vm8, %v1178_v40, 0.0  ;;  %v697_v40 = vrot.slane %v696_v33, 2  ;;  %v395_v25 = vadd.f32 %v394_v24, %v1192_v57 }
 0x369   :  { %v470_v5 = vrot.slane %v469_v58, 4  ;;  %v587_v41 = vmul.f32 0.6931472, %v916_v42 }
 0x36a   :  { %726 = vadd.xlane.f32.xlu1 %v906_v23  ;;  %v536_v59 = vsel %vm382_vm3, %v534_v6, 0.0  ;;  %v698_v28 = vadd.f32 %v697_v40, %v696_v33  ;;  %v628_v23 = vadd.f32 %v627_v62, %v626_v16  ;;  %v396_v19 = vrot.slane %v395_v25, 2 }
 0x36b   :  { %v471_v15 = vadd.f32 %v470_v5, %v469_v58  ;;  %v539_v61 = vsel %vm538_vm9, %v536_v59, 0.0  ;;  %v590_v46 = vadd.f32 %v587_v41, %v1201_v3 }
 0x36c   :  { %v699_v2 = vrot.slane %v698_v28, 1 }
 0x36d   :  { %v472_v32 = vrot.slane %v471_v15, 2 }
 0x36e   :  { %656 = vadd.xlane.f32.xlu1 %v908_v31 }
 0x36f   :  { %v473_v35 = vadd.f32 %v472_v32, %v471_v15  ;;  %v700_v15 = vadd.f32 %v699_v2, %v698_v28 }
 0x371   :  { %v474_v44 = vrot.slane %v473_v35, 1 }
 0x372   :  { %728 = vadd.xlane.f32.xlu1 %v912_v51  ;;  %v589_v51 = vmul.f32 0.6931472, %v914_v38 }
 0x373   :  { %v475_v45 = vadd.f32 %v474_v44, %v473_v35 }
 0x375   :  { %488 = vperm.xlu0 %853, %v475_v45   ;;  %v591_v45 = vadd.f32 %v589_v51, %v1181_v36 }
 0x376   :  { %674 = vadd.xlane.f32.xlu1 %v672_v49 }
 0x379   :  { %854 = vset.pattern.permute.xlu0 %v929_v17  ;;  %v537_v17 = vsel %vm383_vm2, %v535_v21, 0.0  ;;  %v397_v21 = vadd.f32 %v396_v19, %v395_v25 }
 0x37a   :  { %746 = vadd.xlane.f32.xlu1 %v744_v60  ;;  %v540_v63 = vsel %vm538_vm9, %v537_v17, 0.0  ;;  %vm754_vm9 = vcmask 48168  }
 0x37b   :  { %v541_v20 = vadd.f32 %v540_v63, %v539_v61  ;;  %v398_v32 = vrot.slane %v397_v21, 1  ;;  %v764_v63 = vsel %vm754_vm9, %v1010_v13, 0.0  ;;  %v765_v16 = vsel %vm754_vm9, %v1015_v14, 0.0 }
 0x37c   :  { %v766_v40 = vadd.f32 %v765_v16, %v764_v63 }
 0x37d   :  { %v542_v58 = vrot.slane %v541_v20, 4  ;;  %v399_v35 = vadd.f32 %v398_v32, %v397_v21 }
 0x37e   :  { %748 = vadd.xlane.f32.xlu1 %v745_v30  ;;  %v767_v19 = vrot.slane %v766_v40, 4 }
 0x37f   :  { %v543_v5 = vadd.f32 %v542_v58, %v541_v20 }
 0x381   :  { %v544_v31 = vrot.slane %v543_v5, 2 }
 0x383   :  { %v545_v26 = vadd.f32 %v544_v31, %v543_v5 }
 0x385   :  { %v546_v37 = vrot.slane %v545_v26, 1 }
 0x387   :  { %v547_v57 = vadd.f32 %v546_v37, %v545_v26 }
 0x38c   :  { %v605_v44 = vpop.xlane.xlu0 %604 }
 0x38f   :  { %639 = vperm.xlu1 %849, %v628_v23  }
 0x393   :  { %850 = vset.pattern.permute.xlu1 %v930_v56 }
 0x394   :  { %711 = vperm.xlu1 %850, %v700_v15  }
 0x398   :  { %851 = vset.pattern.permute.xlu1 %v925_v1  ;;  %v607_v1 = vsub.f32 %v591_v45, %v605_v44 }
 0x399   :  { %416 = vperm.xlu1 %851, %v399_v35  }
 0x39d   :  { %852 = vset.pattern.permute.xlu1 %v928_v34  ;;  %v609_v34 = vsel %vm383_vm2, %v607_v1, 0.0 }
 0x39e   :  { %560 = vperm.xlu1 %852, %v547_v57   ;;  %v612_v39 = vsel %vm610_vm5, %v609_v34, 0.0 }
 0x3a2   :  { %855 = vset.pattern.permute.xlu1 %v930_v56 }
 0x3ef   :  { %v603_v49 = vpop.xlane.xlu1 %602 }
 0x3f0   :  { %v606_v50 = vsub.f32 %v590_v46, %v603_v49 }
 0x3f2   :  { %v608_v56 = vsel %vm382_vm3, %v606_v50, 0.0 }
 0x3f3   :  { %v611_v52 = vsel %vm610_vm5, %v608_v56, 0.0  ;;  %v655_v54 = vpop.xlane.xlu1 %654 }
 0x3f4   :  { %v613_v55 = vadd.f32 %v612_v39, %v611_v52  ;;  %917 = vlog2.f32 %v655_v54 }
 0x3f6   :  { %v614_v29 = vrot.slane %v613_v55, 4 }
 0x3f7   :  { %v727_v36 = vpop.xlane.xlu1 %726 }
 0x3f8   :  { %v615_v0 = vadd.f32 %v614_v29, %v613_v55  ;;  %919 = vlog2.f32 %v727_v36 }
 0x3fa   :  { %v616_v3 = vrot.slane %v615_v0, 2 }
 0x3fb   :  { %v657_v18 = vpop.xlane.xlu1 %656 }
 0x3fc   :  { %921 = vlog2.f32 %v657_v18  ;;  %v617_v60 = vadd.f32 %v616_v3, %v615_v0 }
 0x3fe   :  { %v918_v6 = vpop.eup %917  ;;  %v618_v7 = vrot.slane %v617_v60, 1 }
 0x3ff   :  { %v659_v8 = vmul.f32 0.6931472, %v918_v6  ;;  %v729_v30 = vpop.xlane.xlu1 %728 }
 0x400   :  { %923 = vlog2.f32 %v729_v30  ;;  %v619_v59 = vadd.f32 %v618_v7, %v617_v60 }
 0x401   :  { %v662_v33 = vadd.f32 %v659_v8, %v1217_v43  ;;  %v677_v43 = vpop.xlane.xlu0 %676 }
 0x402   :  { %v920_v9 = vpop.eup %919  ;;  %632 = vperm.xlu0 %854, %v619_v59  }
 0x403   :  { %v731_v17 = vmul.f32 0.6931472, %v920_v9  ;;  %v675_v61 = vpop.xlane.xlu1 %674 }
 0x404   :  { %v678_v62 = vsub.f32 %v662_v33, %v675_v61 }
 0x405   :  { %v734_v25 = vadd.f32 %v731_v17, %v1221_v4  ;;  %v489_v3 = vpop.permute.xlu0 %488 }
 0x406   :  { %v922_v24 = vpop.eup %921  ;;  %856 = vset.pattern.permute.xlu0 %v931_v47  ;;  %v680_v13 = vsel %vm382_vm3, %v678_v62, 0.0  ;;  %v491_v7 = vsel %vm485_vm12, %v489_v3, 0.0 }
 0x407   :  { %v661_v20 = vmul.f32 0.6931472, %v922_v24  ;;  %v747_v28 = vpop.xlane.xlu1 %746  ;;  %v683_v4 = vsel %vm682_vm6, %v680_v13, 0.0 }
 0x408   :  { %v750_v14 = vsub.f32 %v734_v25, %v747_v28 }
 0x409   :  { %v663_v58 = vadd.f32 %v661_v20, %v1219_v53  ;;  %v768_v53 = vadd.f32 %v767_v19, %v766_v40  ;;  %v788_v20 = vld [vmem:[%s1348_s4] sm:$0x1] }
 0x40a   :  { %v924_v23 = vpop.eup %923  ;;  %v752_v35 = vsel %vm382_vm3, %v750_v14, 0.0  ;;  %vm701_vm3 = vcmp.eq.s32.totalorder %v1062_v48, 4 }
 0x40b   :  { %v679_v2 = vsub.f32 %v663_v58, %v677_v43  ;;  %v733_v5 = vmul.f32 0.6931472, %v924_v23  ;;  %v749_v32 = vpop.xlane.xlu1 %748  ;;  %v755_v51 = vsel %vm754_vm9, %v752_v35, 0.0  ;;  %v791_v58 = vld [vmem:[%s1349_s5] sm:$0x1] }
 0x40d   :  { %v681_v21 = vsel %vm383_vm2, %v679_v2, 0.0  ;;  %v735_v15 = vadd.f32 %v733_v5, %v1223_v22  ;;  %v769_v22 = vrot.slane %v768_v53, 2 }
 0x40e   :  { %v684_v31 = vsel %vm682_vm6, %v681_v21, 0.0 }
 0x40f   :  { %v685_v26 = vadd.f32 %v684_v31, %v683_v4  ;;  %v751_v37 = vsub.f32 %v735_v15, %v749_v32  ;;  %v770_v46 = vadd.f32 %v769_v22, %v768_v53  ;;  %v640_v29 = vpop.permute.xlu1 %639 }
 0x411   :  { %v686_v57 = vrot.slane %v685_v26, 4  ;;  %v753_v38 = vsel %vm383_vm2, %v751_v37, 0.0  ;;  %v771_v56 = vrot.slane %v770_v46, 1  ;;  %vm629_vm2 = vcmp.eq.s32.totalorder %v1062_v48, 3 }
 0x412   :  { %v756_v42 = vsel %vm754_vm9, %v753_v38, 0.0  ;;  %v642_v30 = vsel %vm629_vm2, %v640_v29, 0.0 }
 0x413   :  { %v687_v44 = vadd.f32 %v686_v57, %v685_v26  ;;  %v757_v41 = vadd.f32 %v756_v42, %v755_v51  ;;  %v772_v54 = vadd.f32 %v771_v56, %v770_v46  ;;  %v712_v36 = vpop.permute.xlu1 %711  ;;  %v643_v63 = vadd.f32 %v642_v30, %v1159_v27 }
 0x414   :  { %v714_v33 = vsel %vm701_vm3, %v712_v36, 0.0 }
 0x415   :  { %v758_v45 = vrot.slane %v757_v41, 4  ;;  %v688_v1 = vrot.slane %v687_v44, 2  ;;  %v715_v40 = vadd.f32 %v714_v33, %v643_v63 }
 0x417   :  { %v759_v49 = vadd.f32 %v758_v45, %v757_v41  ;;  %v689_v34 = vadd.f32 %v688_v1, %v687_v44 }
 0x418   :  { %v417_v0 = vpop.permute.xlu1 %416 }
 0x419   :  { %v690_v50 = vrot.slane %v689_v34, 1  ;;  %v760_v11 = vrot.slane %v759_v49, 2  ;;  %v419_v60 = vsel %vm413_vm11, %v417_v0, 0.0 }
 0x41b   :  { %v691_v39 = vadd.f32 %v690_v50, %v689_v34  ;;  %v761_v52 = vadd.f32 %v760_v11, %v759_v49 }
 0x41d   :  { %704 = vperm.xlu1 %855, %v691_v39   ;;  %v762_v10 = vrot.slane %v761_v52, 1  ;;  %v561_v18 = vpop.permute.xlu1 %560 }
 0x41e   :  { %v563_v12 = vsel %vm557_vm14, %v561_v18, 0.0 }
 0x41f   :  { %v763_v55 = vadd.f32 %v762_v10, %v761_v52 }
 0x421   :  { %857 = vset.pattern.permute.xlu1 %v931_v47  ;;  %776 = vperm.xlu0 %856, %v763_v55   ;;  %v492_v47 = vadd.f32 %v491_v7, %v419_v60 }
 0x422   :  { %783 = vperm.xlu1 %857, %v772_v54  }
 0x423   :  { %v564_v59 = vadd.f32 %v563_v12, %v492_v47 }
 0x481   :  { %v633_v6 = vpop.permute.xlu0 %632 }
 0x482   :  { %v635_v8 = vsel %vm629_vm2, %v633_v6, 0.0 }
 0x483   :  { %v636_v61 = vadd.f32 %v635_v8, %v564_v59 }
 0x49c   :  { %v705_v9 = vpop.permute.xlu1 %704 }
 0x49d   :  { %v707_v17 = vsel %vm701_vm3, %v705_v9, 0.0 }
 0x49e   :  { %v708_v16 = vadd.f32 %v707_v17, %v636_v61 }
 0x4a0   :  { %v777_v24 = vpop.permute.xlu0 %776 }
 0x4a1   :  { %v779_v62 = vsel %vm773_vm10, %v777_v24, 0.0  ;;  %v784_v25 = vpop.permute.xlu1 %783 }
 0x4a2   :  { %v780_v28 = vadd.f32 %v779_v62, %v708_v16  ;;  %v786_v23 = vsel %vm773_vm10, %v784_v25, 0.0 }
 0x4a3   :  { %v787_v43 = vadd.f32 %v786_v23, %v715_v40 }
 0x4a4   :  { %v789_v19 = vadd.f32 %v788_v20, %v780_v28 }
 0x4a5   :  { %v792_v48 = vadd.f32 %v791_v58, %v787_v43 }
 0x4a6   :  { %790 = vst [vmem:[%s1348_s4] sm:$0x1] %v789_v19 }
 0x4a7   :  { %793 = vst [vmem:[%s1349_s5] sm:$0x1] %v792_v48 }

</bundles_post_ra>
